<compile_context>
chip_gen: v5e
topology: v5e:2x2
jax: 0.10.0
libtpu: 0.0.40
codegen_flags: <defaults>
</compile_context>

<pallas_src>
import functools

import jax
import jax.numpy as jnp
from jax.experimental import pallas as pl
from jax.experimental.pallas import tpu as pltpu


def _round_up(x, m):
    return (x + m - 1) // m * m


def _pad2(x, rows, cols):
    """Zero-pad a 2-D array up to [rows, cols]."""
    return jnp.pad(x, ((0, rows - x.shape[0]), (0, cols - x.shape[1])))


def _pick_tile(n_pad, requested=None, preferred=512):
    """Largest of {requested, 512, 256, 128} that divides n_pad (n_pad % 128 == 0)."""
    if requested is not None and requested <= n_pad and n_pad % requested == 0:
        return requested
    for t in (preferred, 512, 256, 128):
        if t <= n_pad and n_pad % t == 0:
            return t
    return n_pad


# ---------------------------------------------------------------------------
# Pass 1: conv1 = relu((adj @ X) [@ W1]), K-tiled over adjacency columns.
#         Optionally also emits the bf16 adjacency tile (in-kernel cast).
# ---------------------------------------------------------------------------
def _conv1_kernel(adj_ref, x_ref, w1_ref, *outs, pre_projected, emit_adj):
    if emit_adj:
        conv1_ref, adj_bf_ref, acc_ref = outs
    else:
        conv1_ref, acc_ref = outs
        adj_bf_ref = None

    k = pl.program_id(1)

    @pl.when(k == 0)
    def _():
        acc_ref[...] = jnp.zeros_like(acc_ref)

    adj_bf = adj_ref[...].astype(jnp.bfloat16)     # in-kernel cast (no-op if bf16)
    if emit_adj:
        adj_bf_ref[...] = adj_bf                   # bf16 adjacency for pass 2
    acc_ref[...] += jnp.dot(adj_bf, x_ref[...], preferred_element_type=jnp.float32)

    @pl.when(k == pl.num_programs(1) - 1)
    def _():
        acc = acc_ref[...]
        if pre_projected:                          # X was already feat @ W1
            conv1 = jnp.maximum(acc, 0.0)
        else:
            conv1 = jnp.maximum(
                jnp.dot(acc.astype(jnp.bfloat16), w1_ref[...],
                        preferred_element_type=jnp.float32), 0.0)
        conv1_ref[...] = conv1.astype(conv1_ref.dtype)


# ---------------------------------------------------------------------------
# Pass 2: conv2 (K-tiled adj@conv1) + self-MLP + top MLP (concat folded into
#         three block matmuls).  Per-row work happens once, at the last K step.
# ---------------------------------------------------------------------------
def _conv2_top_kernel(adj_ref, c1_k_ref, feat_ref, c1_row_ref,
                      w2_ref, l1w_ref, l1b_ref, l2w_ref, l2b_ref,
                      m1wa_ref, m1wb_ref, m1wc_ref, m1b_ref,
                      m2w_ref, m2b_ref, out_ref, acc_ref):
    k = pl.program_id(1)

    @pl.when(k == 0)
    def _():
        acc_ref[...] = jnp.zeros_like(acc_ref)

    # K-tiled reduction of adj @ conv1 (f32 accumulation).
    acc_ref[...] += jnp.dot(adj_ref[...], c1_k_ref[...],
                            preferred_element_type=jnp.float32)

    @pl.when(k == pl.num_programs(1) - 1)
    def _():
        # conv2 = (adj @ conv1) @ W2      (no ReLU, matches the reference)
        conv2 = jnp.dot(acc_ref[...].astype(jnp.bfloat16), w2_ref[...],
                        preferred_element_type=jnp.float32)

        # self contribution: Linear2(relu(Linear1(features)))
        feat = feat_ref[...]
        sc_h = jnp.maximum(
            jnp.dot(feat, l1w_ref[...], preferred_element_type=jnp.float32)
            + l1b_ref[...], 0.0)
        sc = (jnp.dot(sc_h.astype(jnp.bfloat16), l2w_ref[...],
                      preferred_element_type=jnp.float32) + l2b_ref[...])

        # top MLP: concat([sc, conv1, conv2]) @ m1w == sum of three block matmuls
        conv1 = c1_row_ref[...]
        z1 = (jnp.dot(sc.astype(jnp.bfloat16), m1wa_ref[...],
                      preferred_element_type=jnp.float32)
              + jnp.dot(conv1, m1wb_ref[...], preferred_element_type=jnp.float32)
              + jnp.dot(conv2.astype(jnp.bfloat16), m1wc_ref[...],
                        preferred_element_type=jnp.float32)
              + m1b_ref[...])
        h1 = jnp.maximum(z1, 0.0)
        out_ref[...] = (jnp.dot(h1.astype(jnp.bfloat16), m2w_ref[...],
                                preferred_element_type=jnp.float32)
                        + m2b_ref[...])


def _forward(features, adj, params, tile_n, tile_k, single_buffer_consts):
    N, in_dim = features.shape
    hid = params["w1"].shape[1]
    out_dim = params["m2w"].shape[1]

    # Padded, lane-dense dims.
    in_p = _round_up(in_dim, 128)
    hid_p = _round_up(hid, 128)
    out_p = _round_up(out_dim, 128)
    n_pad = _round_up(N, 128)
    tile_n = _pick_tile(n_pad, tile_n)
    tile_k = _pick_tile(n_pad, tile_k)
    grid = (n_pad // tile_n, n_pad // tile_k)      # (rows "parallel", K "arbitrary")

    bf16 = jnp.bfloat16

    # Avoid the host-side padded+cast materialization of the N^2 adjacency when N
    # is already 128-aligned: stream f32 adj into pass 1, cast in-kernel, emit
    # the bf16 copy for pass 2.  Otherwise do a single fused pad+cast host-side.
    cast_in_kernel = (n_pad == N)
    if cast_in_kernel:
        adj_in = adj                                       # f32, streamed once
    else:
        adj_in = _pad2(adj, n_pad, n_pad).astype(bf16)     # one fused pad+cast

    feat_p = _pad2(features, n_pad, in_p).astype(bf16)

    w1 = _pad2(params["w1"], in_p, hid_p).astype(bf16)
    w2 = _pad2(params["w2"], hid_p, out_p).astype(bf16)
    l1w = _pad2(params["l1w"], in_p, hid_p).astype(bf16)
    l1b = _pad2(params["l1b"], 1, hid_p)                   # biases stay f32
    l2w = _pad2(params["l2w"], hid_p, out_p).astype(bf16)
    l2b = _pad2(params["l2b"], 1, out_p)
    m1w = params["m1w"]                                    # rows: [self | conv1 | conv2]
    m1wa = _pad2(m1w[:out_dim, :], out_p, hid_p).astype(bf16)
    m1wb = _pad2(m1w[out_dim:out_dim + hid, :], hid_p, hid_p).astype(bf16)
    m1wc = _pad2(m1w[out_dim + hid:, :], out_p, hid_p).astype(bf16)
    m1b = _pad2(params["m1b"], 1, hid_p)
    m2w = _pad2(params["m2w"], hid_p, out_p).astype(bf16)
    m2b = _pad2(params["m2b"], 1, out_p)

    # Cheapest association for the N^2-scaled conv1 matmul:
    #   in_dim >  hidden : adj @ (feat @ W1)  (project once, bf16 MXU, host-side)
    #   in_dim <= hidden : (adj @ feat) @ W1  (in-kernel)
    pre_projected = in_p > hid_p
    if pre_projected:
        x = jnp.dot(feat_p, w1, preferred_element_type=jnp.float32).astype(bf16)
        w1_arg = jnp.zeros((8, 128), bf16)                 # unused placeholder
    else:
        x = feat_p
        w1_arg = w1
    d_x = x.shape[1]

    row = lambda i, k: (i, 0)       # row-tiled operands (re-fetched only when i changes)
    kstream = lambda i, k: (k, 0)   # reduction-streamed operands
    adjmap = lambda i, k: (i, k)    # adjacency tiles

    def const_spec(shape):
        # Constant-index operands never change across the grid -> single buffer.
        if single_buffer_consts:
            return pl.BlockSpec(shape, lambda i, k: (0, 0),
                                pipeline_mode=pl.Buffered(1))
        return pl.BlockSpec(shape, lambda i, k: (0, 0))

    def vmem_limit(adj_itemsize, extra):
        bf, f32 = 2, 4
        weights = ((in_p * hid_p * 2 + hid_p * hid_p + 3 * hid_p * out_p
                    + 2 * out_p * hid_p) * bf + 5 * hid_p * f32)
        est = (2 * tile_n * tile_k * adj_itemsize          # adj tile (double-buffered)
               + 2 * tile_k * max(d_x, hid_p) * bf         # K-streamed operand
               + 2 * tile_n * (in_p + hid_p) * bf          # per-row-tile inputs
               + 2 * tile_n * max(hid_p, out_p) * f32      # output tile
               + tile_n * max(d_x, hid_p) * f32            # accumulator scratch
               + (1 if single_buffer_consts else 2) * weights
               + extra)
        return int(min(est + (8 << 20), 48 << 20))         # safe on v7x's 64 MiB/TC

    # ------------------------- pass 1: conv1 [n_pad, hid_p] ------------------
    conv1_shape = jax.ShapeDtypeStruct((n_pad, hid_p), bf16)
    if cast_in_kernel:
        out_shape1 = (conv1_shape, jax.ShapeDtypeStruct((n_pad, n_pad), bf16))
        out_specs1 = (pl.BlockSpec((tile_n, hid_p), row),
                      pl.BlockSpec((tile_n, tile_k), adjmap))
        adj_itemsize1 = 4
        extra1 = 2 * tile_n * tile_k * 2
    else:
        out_shape1 = (conv1_shape,)
        out_specs1 = (pl.BlockSpec((tile_n, hid_p), row),)
        adj_itemsize1 = 2
        extra1 = 0

    pass1 = pl.pallas_call(
        functools.partial(_conv1_kernel, pre_projected=pre_projected,
                          emit_adj=cast_in_kernel),
        out_shape=out_shape1,
        grid=grid,
        in_specs=[
            pl.BlockSpec((tile_n, tile_k), adjmap),   # adj tile
            pl.BlockSpec((tile_k, d_x), kstream),     # features (or feat @ W1) K tile
            const_spec(w1_arg.shape),                 # W1 (ignored if pre_projected)
        ],
        out_specs=out_specs1,
        scratch_shapes=[pltpu.VMEM((tile_n, d_x), jnp.float32)],
        compiler_params=pltpu.CompilerParams(
            dimension_semantics=("parallel", "arbitrary"),
            vmem_limit_bytes=vmem_limit(adj_itemsize1, extra1)),
        cost_estimate=pl.CostEstimate(
            flops=2 * n_pad * n_pad * d_x
                  + (0 if pre_projected else 2 * n_pad * d_x * hid_p),
            transcendentals=0,
            bytes_accessed=adj_itemsize1 * n_pad * n_pad + 2 * n_pad * d_x
                           + (2 + 2 * extra1 // max(extra1, 1)) * n_pad * hid_p),
    )(adj_in, x, w1_arg)

    if cast_in_kernel:
        conv1, adj_bf = pass1
    else:
        (conv1,) = pass1
        adj_bf = adj_in

    # ---------------- pass 2: conv2 + self-MLP + top MLP ---------------------
    out_padded = pl.pallas_call(
        _conv2_top_kernel,
        out_shape=jax.ShapeDtypeStruct((n_pad, out_p), jnp.float32),
        grid=grid,
        in_specs=[
            pl.BlockSpec((tile_n, tile_k), adjmap),   # adj (bf16) tile
            pl.BlockSpec((tile_k, hid_p), kstream),   # conv1 K tile (adj @ conv1)
            pl.BlockSpec((tile_n, in_p), row),        # features row tile (self-MLP)
            pl.BlockSpec((tile_n, hid_p), row),       # conv1 row tile (top MLP)
            const_spec((hid_p, out_p)),               # W2
            const_spec((in_p, hid_p)),                # l1w
            const_spec((1, hid_p)),                   # l1b
            const_spec((hid_p, out_p)),               # l2w
            const_spec((1, out_p)),                   # l2b
            const_spec((out_p, hid_p)),               # m1w (self block)
            const_spec((hid_p, hid_p)),               # m1w (conv1 block)
            const_spec((out_p, hid_p)),               # m1w (conv2 block)
            const_spec((1, hid_p)),                   # m1b
            const_spec((hid_p, out_p)),               # m2w
            const_spec((1, out_p)),                   # m2b
        ],
        out_specs=pl.BlockSpec((tile_n, out_p), row),
        scratch_shapes=[pltpu.VMEM((tile_n, hid_p), jnp.float32)],
        compiler_params=pltpu.CompilerParams(
            dimension_semantics=("parallel", "arbitrary"),
            vmem_limit_bytes=vmem_limit(2, 0)),
        cost_estimate=pl.CostEstimate(
            flops=2 * n_pad * n_pad * hid_p
                  + 2 * n_pad * (3 * hid_p * out_p + in_p * hid_p
                                 + 2 * out_p * hid_p + hid_p * hid_p),
            transcendentals=0,
            bytes_accessed=2 * n_pad * n_pad + 4 * n_pad * hid_p
                           + 2 * n_pad * in_p + 4 * n_pad * out_p),
    )(adj_bf, conv1, feat_p, conv1,
      w2, l1w, l1b, l2w, l2b, m1wa, m1wb, m1wc, m1b, m2w, m2b)

    return out_padded[:N, :out_dim]


def graph_convolution_forward(features, adj, params, *, tile_n=None, tile_k=None):
    """features: [N, in_dim] f32, adj: [N, N] f32 (dense).  Returns [N, out_dim] f32."""
    try:
        return _forward(features, adj, params, tile_n, tile_k,
                        single_buffer_consts=True)
    except Exception:
        # pl.Buffered(1) single-buffering of constant operands is a pure VMEM
        # optimization; fall back to default double-buffering if this
        # JAX/Mosaic build rejects the pipeline_mode hint.
        return _forward(features, adj, params, tile_n, tile_k,
                        single_buffer_consts=False)


def init_params(key, in_dim, hidden_dim, out_dim):
    """Deterministic synthetic parameters matching the PyTorch module's shapes.
    Linear weights are stored pre-transposed as [fan_in, fan_out] so the kernel
    computes x @ W + b directly (a real PyTorch state_dict needs a transpose)."""
    ks = jax.random.split(key, 12)

    def nrm(k, shape, fan_in):
        return (jax.random.normal(k, shape, jnp.float32)
                * jnp.sqrt(2.0 / fan_in)).astype(jnp.float32)

    cat_dim = out_dim + hidden_dim + out_dim  # mlp_1 input dim
    return {
        # graph_convolution_layer.weight / weight2 (kaiming_normal_)
        "w1": nrm(ks[0], (in_dim, hidden_dim), in_dim),
        "w2": nrm(ks[1], (hidden_dim, out_dim), hidden_dim),
        # gc.mlp_layer_1 / mlp_layer_2 (nn.Linear with bias)
        "l1w": nrm(ks[2], (in_dim, hidden_dim), in_dim),
        "l1b": nrm(ks[3], (1, hidden_dim), in_dim),
        "l2w": nrm(ks[4], (hidden_dim, out_dim), hidden_dim),
        "l2b": nrm(ks[5], (1, out_dim), hidden_dim),
        # top mlp_1 / mlp_2
        "m1w": nrm(ks[6], (cat_dim, hidden_dim), cat_dim),
        "m1b": nrm(ks[7], (1, hidden_dim), cat_dim),
        "m2w": nrm(ks[8], (hidden_dim, out_dim), hidden_dim),
        "m2b": nrm(ks[9], (1, out_dim), hidden_dim),
    }


def reference_forward(features, adj, params):
    """Plain-JAX f32 reference mirroring the PyTorch forward exactly."""
    conv1 = jax.nn.relu(adj @ features @ params["w1"])
    conv2 = adj @ conv1 @ params["w2"]
    sc = (jax.nn.relu(features @ params["l1w"] + params["l1b"])
          @ params["l2w"] + params["l2b"])
    h = jnp.concatenate([sc, conv1, conv2], axis=1)
    h = jax.nn.relu(h @ params["m1w"] + params["m1b"])
    return h @ params["m2w"] + params["m2b"]


def _make_problem(key, n, in_dim):
    k_feat, k_adj = jax.random.split(key)
    features = jax.random.normal(k_feat, (n, in_dim), jnp.float32)
    # symmetric row-normalized dense adjacency (spmm treated as dense matmul)
    a = (jax.random.uniform(k_adj, (n, n)) > 0.5).astype(jnp.float32)
    a = jnp.maximum(a, a.T) + jnp.eye(n, dtype=jnp.float32)
    adj = a / jnp.sum(a, axis=1, keepdims=True)
    return features, adj


if __name__ == "__main__":
    key = jax.random.PRNGKey(0)
    k1, k2, k3, k4 = jax.random.split(key, 4)

    # Config A: small, unaligned N -> host-side fused pad+cast path, in-kernel W1.
    # Config B: 128-aligned N, in_dim > hidden -> in-kernel adj cast (bf16 adj
    #           emitted by pass 1) + bf16 host pre-projection path.
    configs = [
        dict(N=8, IN=16, HID=32, OUT=16, kp=k1, kd=k2),
        dict(N=128, IN=160, HID=32, OUT=16, kp=k3, kd=k4),
    ]

    for cfg in configs:
        features, adj = _make_problem(cfg["kd"], cfg["N"], cfg["IN"])
        params = init_params(cfg["kp"], cfg["IN"], cfg["HID"], cfg["OUT"])

        out = graph_convolution_forward(features, adj, params)
        out = jax.block_until_ready(out)

        ref = reference_forward(features, adj, params)
        assert out.shape == (cfg["N"], cfg["OUT"])
        # bf16 matmuls with f32 accumulation -> loosened tolerance vs f32 reference.
        rel_err = float(jnp.max(jnp.abs(out - ref)) / (jnp.max(jnp.abs(ref)) + 1e-6))
        assert rel_err < 4e-2, f"mismatch vs JAX reference (cfg={cfg}): rel_err={rel_err}"

    print("KERNEL_OK")
</pallas_src>

<mosaic_0001>
module attributes {stable_mosaic.version = 11 : i64} {
  func.func @_conv1_kernel(%arg0: i32, %arg1: i32, %arg2: memref<128x128xbf16, #tpu.memory_space<vmem>>, %arg3: memref<128x128xbf16, #tpu.memory_space<vmem>>, %arg4: memref<128x128xbf16, #tpu.memory_space<vmem>>, %arg5: memref<128x128xbf16, #tpu.memory_space<vmem>>, %arg6: memref<128x128xf32, #tpu.memory_space<vmem>>) attributes {dimension_semantics = [#tpu.dimension_semantics<parallel>, #tpu.dimension_semantics<arbitrary>], iteration_bounds = array<i64: 1, 1>, scalar_prefetch = 0 : i64, scratch_operands = 1 : i64, tpu.core_type = #tpu.core_type<tc>, window_params = [{transform_indices = @transform_0, window_bounds = array<i64: 128, 128>}, {transform_indices = @transform_1, window_bounds = array<i64: 128, 128>}, {pipeline_mode = #tpu.pipeline_mode<synchronous>, transform_indices = @transform_2, window_bounds = array<i64: 128, 128>}, {transform_indices = @transform_3, window_bounds = array<i64: 128, 128>}]} {
    %c0_i32 = arith.constant 0 : i32
    %0 = arith.cmpi eq, %arg1, %c0_i32 : i32
    %1 = arith.extui %0 : i1 to i32
    %c0_i32_0 = arith.constant 0 : i32
    %2 = arith.cmpi ne, %1, %c0_i32_0 : i32
    scf.if %2 {
      %cst_10 = arith.constant 0.000000e+00 : f32
      %12 = vector.broadcast %cst_10 : f32 to vector<128x128xf32>
      %c0_11 = arith.constant 0 : index
      %c0_12 = arith.constant 0 : index
      %13 = vector.load %arg6[%c0_11, %c0_12] : memref<128x128xf32, #tpu.memory_space<vmem>>, vector<128x128xf32>
      tpu.vector_store %arg6[%c0_11, %c0_12], %12 {strides = array<i32>} : memref<128x128xf32, #tpu.memory_space<vmem>>, vector<128x128xf32>,
    } else {
    }
    %c0 = arith.constant 0 : index
    %c0_1 = arith.constant 0 : index
    %3 = vector.load %arg2[%c0, %c0_1] : memref<128x128xbf16, #tpu.memory_space<vmem>>, vector<128x128xbf16>
    %c0_2 = arith.constant 0 : index
    %c0_3 = arith.constant 0 : index
    %4 = vector.load %arg6[%c0_2, %c0_3] : memref<128x128xf32, #tpu.memory_space<vmem>>, vector<128x128xf32>
    %c0_4 = arith.constant 0 : index
    %c0_5 = arith.constant 0 : index
    %5 = vector.load %arg3[%c0_4, %c0_5] : memref<128x128xbf16, #tpu.memory_space<vmem>>, vector<128x128xbf16>
    %cst = arith.constant dense<0.000000e+00> : vector<128x128xf32>
    %6 = tpu.matmul %3, %5, %cst {dimension_numbers = #tpu.dot_dimension_numbers<[1], [0], [0], [1], [0, 0, 1, 1], [], []>} : vector<128x128xbf16>, vector<128x128xbf16>, vector<128x128xf32> -> vector<128x128xf32>
    %7 = arith.addf %4, %6 : vector<128x128xf32>
    %c0_6 = arith.constant 0 : index
    %c0_7 = arith.constant 0 : index
    %8 = vector.load %arg6[%c0_6, %c0_7] : memref<128x128xf32, #tpu.memory_space<vmem>>, vector<128x128xf32>
    tpu.vector_store %arg6[%c0_6, %c0_7], %7 {strides = array<i32>} : memref<128x128xf32, #tpu.memory_space<vmem>>, vector<128x128xf32>,
    %c0_i32_8 = arith.constant 0 : i32
    %9 = arith.cmpi eq, %arg1, %c0_i32_8 : i32
    %10 = arith.extui %9 : i1 to i32
    %c0_i32_9 = arith.constant 0 : i32
    %11 = arith.cmpi ne, %10, %c0_i32_9 : i32
    scf.if %11 {
      %c0_10 = arith.constant 0 : index
      %c0_11 = arith.constant 0 : index
      %12 = vector.load %arg6[%c0_10, %c0_11] : memref<128x128xf32, #tpu.memory_space<vmem>>, vector<128x128xf32>
      %13 = arith.truncf %12 : vector<128x128xf32> to vector<128x128xbf16>
      %c0_12 = arith.constant 0 : index
      %c0_13 = arith.constant 0 : index
      %14 = vector.load %arg4[%c0_12, %c0_13] : memref<128x128xbf16, #tpu.memory_space<vmem>>, vector<128x128xbf16>
      %cst_14 = arith.constant dense<0.000000e+00> : vector<128x128xf32>
      %15 = tpu.matmul %13, %14, %cst_14 {dimension_numbers = #tpu.dot_dimension_numbers<[1], [0], [0], [1], [0, 0, 1, 1], [], []>} : vector<128x128xbf16>, vector<128x128xbf16>, vector<128x128xf32> -> vector<128x128xf32>
      %cst_15 = arith.constant 0.000000e+00 : f32
      %16 = vector.broadcast %cst_15 : f32 to vector<128x128xf32>
      %17 = arith.maximumf %15, %16 : vector<128x128xf32>
      %18 = arith.truncf %17 : vector<128x128xf32> to vector<128x128xbf16>
      %c0_16 = arith.constant 0 : index
      %c0_17 = arith.constant 0 : index
      %19 = vector.load %arg5[%c0_16, %c0_17] : memref<128x128xbf16, #tpu.memory_space<vmem>>, vector<128x128xbf16>
      tpu.vector_store %arg5[%c0_16, %c0_17], %18 {strides = array<i32>} : memref<128x128xbf16, #tpu.memory_space<vmem>>, vector<128x128xbf16>,
    } else {
    }
    return
  }
  func.func @transform_0(%arg0: i32, %arg1: i32) -> (i32, i32) {
    %c0_i32 = arith.constant 0 : i32
    return %arg0, %arg1 : i32, i32
  }
  func.func @transform_1(%arg0: i32, %arg1: i32) -> (i32, i32) {
    %c0_i32 = arith.constant 0 : i32
    %c0_i32_0 = arith.constant 0 : i32
    return %arg1, %c0_i32 : i32, i32
  }
  func.func @transform_2(%arg0: i32, %arg1: i32) -> (i32, i32) {
    %c0_i32 = arith.constant 0 : i32
    %c0_i32_0 = arith.constant 0 : i32
    %c0_i32_1 = arith.constant 0 : i32
    return %c0_i32, %c0_i32_0 : i32, i32
  }
  func.func @transform_3(%arg0: i32, %arg1: i32) -> (i32, i32) {
    %c0_i32 = arith.constant 0 : i32
    %c0_i32_0 = arith.constant 0 : i32
    return %arg0, %c0_i32 : i32, i32
  }
}

module attributes {stable_mosaic.version = 11 : i64} {
  func.func @_conv1_kernel(%arg0: i32, %arg1: i32, %arg2: memref<128x128xbf16, #tpu.memory_space<vmem>>, %arg3: memref<128x128xbf16, #tpu.memory_space<vmem>>, %arg4: memref<128x128xbf16, #tpu.memory_space<vmem>>, %arg5: memref<128x128xbf16, #tpu.memory_space<vmem>>, %arg6: memref<128x128xf32, #tpu.memory_space<vmem>>) attributes {dimension_semantics = [#tpu.dimension_semantics<parallel>, #tpu.dimension_semantics<arbitrary>], iteration_bounds = array<i64: 1, 1>, scalar_prefetch = 0 : i64, scratch_operands = 1 : i64, tpu.core_type = #tpu.core_type<tc>, window_params = [{transform_indices = @transform_0, window_bounds = array<i64: 128, 128>}, {transform_indices = @transform_1, window_bounds = array<i64: 128, 128>}, {pipeline_mode = #tpu.pipeline_mode<synchronous>, transform_indices = @transform_2, window_bounds = array<i64: 128, 128>}, {transform_indices = @transform_3, window_bounds = array<i64: 128, 128>}]} {
    %c0_i32 = arith.constant 0 : i32
    %0 = arith.cmpi eq, %arg1, %c0_i32 : i32
    %1 = arith.extui %0 : i1 to i32
    %c0_i32_0 = arith.constant 0 : i32
    %2 = arith.cmpi ne, %1, %c0_i32_0 : i32
    scf.if %2 {
      %cst_10 = arith.constant 0.000000e+00 : f32
      %12 = vector.broadcast %cst_10 : f32 to vector<128x128xf32>
      %c0_11 = arith.constant 0 : index
      %c0_12 = arith.constant 0 : index
      %13 = vector.load %arg6[%c0_11, %c0_12] : memref<128x128xf32, #tpu.memory_space<vmem>>, vector<128x128xf32>
      tpu.vector_store %arg6[%c0_11, %c0_12], %12 {strides = array<i32>} : memref<128x128xf32, #tpu.memory_space<vmem>>, vector<128x128xf32>,
    } else {
    }
    %c0 = arith.constant 0 : index
    %c0_1 = arith.constant 0 : index
    %3 = vector.load %arg2[%c0, %c0_1] : memref<128x128xbf16, #tpu.memory_space<vmem>>, vector<128x128xbf16>
    %c0_2 = arith.constant 0 : index
    %c0_3 = arith.constant 0 : index
    %4 = vector.load %arg6[%c0_2, %c0_3] : memref<128x128xf32, #tpu.memory_space<vmem>>, vector<128x128xf32>
    %c0_4 = arith.constant 0 : index
    %c0_5 = arith.constant 0 : index
    %5 = vector.load %arg3[%c0_4, %c0_5] : memref<128x128xbf16, #tpu.memory_space<vmem>>, vector<128x128xbf16>
    %cst = arith.constant dense<0.000000e+00> : vector<128x128xf32>
    %6 = tpu.matmul %3, %5, %cst {dimension_numbers = #tpu.dot_dimension_numbers<[1], [0], [0], [1], [0, 0, 1, 1], [], []>} : vector<128x128xbf16>, vector<128x128xbf16>, vector<128x128xf32> -> vector<128x128xf32>
    %7 = arith.addf %4, %6 : vector<128x128xf32>
    %c0_6 = arith.constant 0 : index
    %c0_7 = arith.constant 0 : index
    %8 = vector.load %arg6[%c0_6, %c0_7] : memref<128x128xf32, #tpu.memory_space<vmem>>, vector<128x128xf32>
    tpu.vector_store %arg6[%c0_6, %c0_7], %7 {strides = array<i32>} : memref<128x128xf32, #tpu.memory_space<vmem>>, vector<128x128xf32>,
    %c0_i32_8 = arith.constant 0 : i32
    %9 = arith.cmpi eq, %arg1, %c0_i32_8 : i32
    %10 = arith.extui %9 : i1 to i32
    %c0_i32_9 = arith.constant 0 : i32
    %11 = arith.cmpi ne, %10, %c0_i32_9 : i32
    scf.if %11 {
      %c0_10 = arith.constant 0 : index
      %c0_11 = arith.constant 0 : index
      %12 = vector.load %arg6[%c0_10, %c0_11] : memref<128x128xf32, #tpu.memory_space<vmem>>, vector<128x128xf32>
      %13 = arith.truncf %12 : vector<128x128xf32> to vector<128x128xbf16>
      %c0_12 = arith.constant 0 : index
      %c0_13 = arith.constant 0 : index
      %14 = vector.load %arg4[%c0_12, %c0_13] : memref<128x128xbf16, #tpu.memory_space<vmem>>, vector<128x128xbf16>
      %cst_14 = arith.constant dense<0.000000e+00> : vector<128x128xf32>
      %15 = tpu.matmul %13, %14, %cst_14 {dimension_numbers = #tpu.dot_dimension_numbers<[1], [0], [0], [1], [0, 0, 1, 1], [], []>} : vector<128x128xbf16>, vector<128x128xbf16>, vector<128x128xf32> -> vector<128x128xf32>
      %cst_15 = arith.constant 0.000000e+00 : f32
      %16 = vector.broadcast %cst_15 : f32 to vector<128x128xf32>
      %17 = arith.maximumf %15, %16 : vector<128x128xf32>
      %18 = arith.truncf %17 : vector<128x128xf32> to vector<128x128xbf16>
      %c0_16 = arith.constant 0 : index
      %c0_17 = arith.constant 0 : index
      %19 = vector.load %arg5[%c0_16, %c0_17] : memref<128x128xbf16, #tpu.memory_space<vmem>>, vector<128x128xbf16>
      tpu.vector_store %arg5[%c0_16, %c0_17], %18 {strides = array<i32>} : memref<128x128xbf16, #tpu.memory_space<vmem>>, vector<128x128xbf16>,
    } else {
    }
    return
  }
  func.func @transform_0(%arg0: i32, %arg1: i32) -> (i32, i32) {
    %c0_i32 = arith.constant 0 : i32
    return %arg0, %arg1 : i32, i32
  }
  func.func @transform_1(%arg0: i32, %arg1: i32) -> (i32, i32) {
    %c0_i32 = arith.constant 0 : i32
    %c0_i32_0 = arith.constant 0 : i32
    return %arg1, %c0_i32 : i32, i32
  }
  func.func @transform_2(%arg0: i32, %arg1: i32) -> (i32, i32) {
    %c0_i32 = arith.constant 0 : i32
    %c0_i32_0 = arith.constant 0 : i32
    %c0_i32_1 = arith.constant 0 : i32
    return %c0_i32, %c0_i32_0 : i32, i32
  }
  func.func @transform_3(%arg0: i32, %arg1: i32) -> (i32, i32) {
    %c0_i32 = arith.constant 0 : i32
    %c0_i32_0 = arith.constant 0 : i32
    return %arg0, %c0_i32 : i32, i32
  }
}

</mosaic_0001>

<bundles_post_ra>
// kernel: tpu_custom_call.1
= control target key start
LH: loop header
LB: loop body
LE: loop exit
PB: predicated region body
PF: predicated region fallthrough
CT: control target
= control target key end

     0   :  { %8 = vsyncpa [#allocation4], 0  ;;  %s856_s0 = inlined_call_operand.hbm [shape: bf16[128,128], index: 0, kind: input, shape index: {}]   ;;  %s857_s1 = inlined_call_operand.hbm [shape: bf16[128,128], index: 1, kind: input, shape index: {}]   ;;  %s858_s2 = inlined_call_operand.hbm [shape: bf16[128,128], index: 2, kind: input, shape index: {}]   ;;  %s859_s3 = inlined_call_operand.hbm [shape: bf16[128,128], index: 3, kind: output, shape index: {}]  }
   0x1   :  { %9 = vsyncpa [#allocation7], 0 }
   0x2   :  { %10 = vsyncpa [#allocation5], 0  ;;  %s28_s14 = sshll.u32 %s857_s1, 4  ;;  %s806_s15 = smov [#allocation6]   ;;  %s29_s14 = int_to_ptr.hbm [resolvable:$true] %s28_s14 }
   0x3   :  { %s30_s16 = sshll.u32 %s806_s15, 4  ;;  %s15_s19 = sshll.u32 %s856_s0, 4  ;;  %s31_s16 = int_to_ptr.vmem [resolvable:$true] %s30_s16  ;;  %s16_s19 = int_to_ptr.hbm [resolvable:$true] %s15_s19 }
   0x4   :  { %s807_s20 = smov 64   ;;  %s808_s21 = smov 4  }
   0x5   :  { %36 = dma.hbm_to_vmem [thread:$0]  %s29_s14, 1024, %s31_s16, [#allocation7], %s807_s20, %s807_s20, %s808_s21  }
   0x6   :  { %s809_s22 = smov [#allocation3]   ;;  %s41_s1 = sshll.u32 %s858_s2, 4  ;;  %s42_s1 = int_to_ptr.hbm [resolvable:$true] %s41_s1 }
   0x7   :  { %s17_s23 = sshll.u32 %s809_s22, 4  ;;  %s810_s0 = smov [#allocation8]   ;;  %s18_s23 = int_to_ptr.vmem [resolvable:$true] %s17_s23 }
   0x8   :  { %23 = dma.hbm_to_vmem [thread:$0]  %s16_s19, 1024, %s18_s23, [#allocation4], %s807_s20, %s807_s20, %s808_s21  }
   0x9   :  { %s43_s26 = sshll.u32 %s810_s0, 4  ;;  %s44_s26 = int_to_ptr.vmem [resolvable:$true] %s43_s26 }
   0xa   :  { %49 = dma.hbm_to_vmem [thread:$0]  %s42_s1, 1024, %s44_s26, [#allocation7], %s807_s20, %s807_s20, %s808_s21  }
   0xb   :  { %800 = dma.done.wait [#allocation4], 1024  }
   0xc   :  { %801 = vsyncadd [#allocation4], 4294966272 }
   0xd   :  { %802 = dma.done.wait [#allocation7], 2048  }
   0xe   :  { %803 = vsyncadd [#allocation7], 4294965248  ;;  %v626_v0 = vld [vmem:[#allocation6 + $0x38] sm:$0xff]  ;;  %v625_v1 = vld [vmem:[#allocation6 + $0x30] sm:$0xff]  ;;  %s811_s2 = smov [#allocation9]   ;;  %s501_s30 = sshll.u32 %s859_s3, 4  ;;  %s502_s30 = int_to_ptr.hbm [resolvable:$true] %s501_s30 }
   0xf   :  { %226 = vmatpush.bf16.msra.mxu0 %v626_v0  ;;  %682 = vmatpush.bf16.msra.mxu2 %v626_v0  ;;  %v624_v2 = vld [vmem:[#allocation6 + $0x28] sm:$0xff]  ;;  %v623_v3 = vld [vmem:[#allocation6 + $0x20] sm:$0xff]  ;;  %v622_v4 = vld [vmem:[#allocation6 + $0x18] sm:$0xff]  ;;  %s499_s27 = sshll.u32 %s811_s2, 4  ;;  %s500_s27 = int_to_ptr.vmem [resolvable:$true] %s499_s27 }
  0x10   :  { %v621_v5 = vld [vmem:[#allocation6 + $0x10] sm:$0xff]  ;;  %v620_v6 = vld [vmem:[#allocation6 + $0x8] sm:$0xff]  ;;  %v619_v7 = vld [vmem:[#allocation6] sm:$0xff] }
  0x11   :  { %v611_v8 = vld [vmem:[#allocation3] sm:$0xff]  ;;  %v612_v10 = vld [vmem:[#allocation3 + $0x8] sm:$0xff]  ;;  %v634_v12 = vld [vmem:[#allocation8 + $0x38] sm:$0xff] }
  0x12   :  { %v615_v9 = vld [vmem:[#allocation3 + $0x20] sm:$0xff]  ;;  %v616_v11 = vld [vmem:[#allocation3 + $0x28] sm:$0xff]  ;;  %398 = vmatpush.bf16.msra.mxu1 %v634_v12  ;;  %v633_v13 = vld [vmem:[#allocation8 + $0x30] sm:$0xff]  ;;  %690 = vmatpush.bf16.msra.mxu3 %v634_v12 }
  0x13   :  { %227 = vmatpush.bf16.msra.mxu0 %v625_v1  ;;  %683 = vmatpush.bf16.msra.mxu2 %v625_v1  ;;  %v632_v14 = vld [vmem:[#allocation8 + $0x28] sm:$0xff]  ;;  %v631_v15 = vld [vmem:[#allocation8 + $0x20] sm:$0xff]  ;;  %v613_v16 = vld [vmem:[#allocation3 + $0x10] sm:$0xff] }
  0x14   :  { %v617_v17 = vld [vmem:[#allocation3 + $0x30] sm:$0xff]  ;;  %v630_v18 = vld [vmem:[#allocation8 + $0x18] sm:$0xff]  ;;  %v628_v22 = vld [vmem:[#allocation8 + $0x8] sm:$0xff] }
  0x15   :  { %v614_v19 = vld [vmem:[#allocation3 + $0x18] sm:$0xff]  ;;  %v629_v21 = vld [vmem:[#allocation8 + $0x10] sm:$0xff]  ;;  %v627_v23 = vld [vmem:[#allocation8] sm:$0xff] }
  0x16   :  { %399 = vmatpush.bf16.msra.mxu1 %v633_v13  ;;  %691 = vmatpush.bf16.msra.mxu3 %v633_v13  ;;  %v618_v20 = vld [vmem:[#allocation3 + $0x38] sm:$0xff] }
  0x17   :  { %228 = vmatpush.bf16.msra.mxu0 %v624_v2  ;;  %684 = vmatpush.bf16.msra.mxu2 %v624_v2 }
  0x1a   :  { %400 = vmatpush.bf16.msra.mxu1 %v632_v14  ;;  %692 = vmatpush.bf16.msra.mxu3 %v632_v14 }
  0x1b   :  { %229 = vmatpush.bf16.msra.mxu0 %v623_v3  ;;  %685 = vmatpush.bf16.msra.mxu2 %v623_v3 }
  0x1e   :  { %401 = vmatpush.bf16.msra.mxu1 %v631_v15  ;;  %693 = vmatpush.bf16.msra.mxu3 %v631_v15 }
  0x1f   :  { %230 = vmatpush.bf16.msra.mxu0 %v622_v4  ;;  %686 = vmatpush.bf16.msra.mxu2 %v622_v4 }
  0x22   :  { %402 = vmatpush.bf16.msra.mxu1 %v630_v18  ;;  %694 = vmatpush.bf16.msra.mxu3 %v630_v18 }
  0x23   :  { %231 = vmatpush.bf16.msra.mxu0 %v621_v5  ;;  %687 = vmatpush.bf16.msra.mxu2 %v621_v5 }
  0x26   :  { %403 = vmatpush.bf16.msra.mxu1 %v629_v21  ;;  %695 = vmatpush.bf16.msra.mxu3 %v629_v21 }
  0x27   :  { %232 = vmatpush.bf16.msra.mxu0 %v620_v6  ;;  %688 = vmatpush.bf16.msra.mxu2 %v620_v6 }
  0x2a   :  { %404 = vmatpush.bf16.msra.mxu1 %v628_v22  ;;  %696 = vmatpush.bf16.msra.mxu3 %v628_v22 }
  0x2b   :  { %233 = vmatpush.bf16.msra.mxu0 %v619_v7  ;;  %689 = vmatpush.bf16.msra.mxu2 %v619_v7 }
  0x2e   :  { %234 = vmatmul.bf16.vlgmr.msra.gmra.mxu0 %v611_v8  ;;  %254 = vmatmul.bf16.vlgmr.msra.gmra.mxu2 %v615_v9 }
  0x2f   :  { %405 = vmatpush.bf16.msra.mxu1 %v627_v23  ;;  %697 = vmatpush.bf16.msra.mxu3 %v627_v23 }
  0x3e   :  { %239 = vmatmul.bf16.gmra.mxu0 %v612_v10  ;;  %259 = vmatmul.bf16.gmra.mxu2 %v616_v11 }
  0x4e   :  { %244 = vmatmul.bf16.gmra.mxu0 %v613_v16  ;;  %264 = vmatmul.bf16.gmra.mxu2 %v617_v17 }
  0x5e   :  { %249 = vmatmul.bf16.gmra.mxu0 %v614_v19  ;;  %269 = vmatmul.bf16.gmra.mxu2 %v618_v20 }
  0xab   :  { %v235_v24 = vpop.f32.mrf.mxu0 }
  0xb1   :  { %v255_v25 = vpop.f32.mrf.mxu2 }
  0xb3   :  { %v237_v26 = vpop.f32.mrf.mxu0 }
  0xb4   :  { %v326_v27 = vpack.c.bf16 %v237_v26, %v235_v24 }
  0xb6   :  { %406 = vmatmul.bf16.vlgmr.msra.gmra.mxu1 %v326_v27 }
  0xb9   :  { %v257_v28 = vpop.f32.mrf.mxu2 }
  0xba   :  { %v330_v29 = vpack.c.bf16 %v257_v28, %v255_v25 }
  0xbb   :  { %v240_v30 = vpop.f32.mrf.mxu0 }
  0xbc   :  { %426 = vmatmul.bf16.vlgmr.msra.gmra.mxu3 %v330_v29 }
  0xc1   :  { %v260_v31 = vpop.f32.mrf.mxu2 }
  0xc3   :  { %v242_v32 = vpop.f32.mrf.mxu0 }
  0xc4   :  { %v327_v33 = vpack.c.bf16 %v242_v32, %v240_v30 }
  0xc6   :  { %411 = vmatmul.bf16.gmra.mxu1 %v327_v33 }
  0xc9   :  { %v262_v34 = vpop.f32.mrf.mxu2 }
  0xca   :  { %v331_v35 = vpack.c.bf16 %v262_v34, %v260_v31 }
  0xcb   :  { %v245_v36 = vpop.f32.mrf.mxu0 }
  0xcc   :  { %431 = vmatmul.bf16.gmra.mxu3 %v331_v35 }
  0xd1   :  { %v265_v37 = vpop.f32.mrf.mxu2 }
  0xd3   :  { %v247_v38 = vpop.f32.mrf.mxu0 }
  0xd4   :  { %v328_v39 = vpack.c.bf16 %v247_v38, %v245_v36 }
  0xd6   :  { %416 = vmatmul.bf16.gmra.mxu1 %v328_v39 }
  0xd9   :  { %v267_v40 = vpop.f32.mrf.mxu2 }
  0xda   :  { %v332_v41 = vpack.c.bf16 %v267_v40, %v265_v37 }
  0xdb   :  { %v250_v42 = vpop.f32.mrf.mxu0 }
  0xdc   :  { %436 = vmatmul.bf16.gmra.mxu3 %v332_v41 }
  0xe1   :  { %v270_v43 = vpop.f32.mrf.mxu2 }
  0xe3   :  { %v252_v44 = vpop.f32.mrf.mxu0 }
  0xe4   :  { %v329_v45 = vpack.c.bf16 %v252_v44, %v250_v42 }
  0xe6   :  { %421 = vmatmul.bf16.gmra.mxu1 %v329_v45 }
  0xe9   :  { %v272_v46 = vpop.f32.mrf.mxu2 }
  0xea   :  { %v333_v47 = vpack.c.bf16 %v272_v46, %v270_v43 }
  0xec   :  { %441 = vmatmul.bf16.gmra.mxu3 %v333_v47 }
 0x133   :  { %v407_v48 = vpop.f32.mrf.mxu1 }
 0x134   :  { %v447_v50 = vmax.f32 %v407_v48, 0.0 }
 0x13b   :  { %v409_v49 = vpop.f32.mrf.mxu1 }
 0x13c   :  { %v448_v51 = vmax.f32 %v409_v49, 0.0 }
 0x13e   :  { %v638_v52 = vpack.c.bf16 %v448_v51, %v447_v50 }
 0x13f   :  { %v427_v53 = vpop.f32.mrf.mxu3 }
 0x140   :  { %639 = vst [vmem:[#allocation9] sm:$0xff] %v638_v52   ;;  %v455_v56 = vmax.f32 %v427_v53, 0.0 }
 0x143   :  { %v412_v54 = vpop.f32.mrf.mxu1 }
 0x144   :  { %v449_v60 = vmax.f32 %v412_v54, 0.0 }
 0x147   :  { %v429_v55 = vpop.f32.mrf.mxu3 }
 0x148   :  { %v456_v57 = vmax.f32 %v429_v55, 0.0 }
 0x14a   :  { %v658_v58 = vpack.c.bf16 %v456_v57, %v455_v56 }
 0x14b   :  { %v414_v59 = vpop.f32.mrf.mxu1 }
 0x14c   :  { %678 = vst [vmem:[#allocation9 + $0x20] sm:$0xff] %v658_v58   ;;  %v450_v61 = vmax.f32 %v414_v59, 0.0 }
 0x14e   :  { %v643_v62 = vpack.c.bf16 %v450_v61, %v449_v60 }
 0x14f   :  { %v432_v63 = vpop.f32.mrf.mxu3 }
 0x150   :  { %675 = vst [vmem:[#allocation9 + $0x8] sm:$0xff] %v643_v62   ;;  %v457_v2 = vmax.f32 %v432_v63, 0.0 }
 0x153   :  { %v417_v0 = vpop.f32.mrf.mxu1 }
 0x154   :  { %v451_v6 = vmax.f32 %v417_v0, 0.0 }
 0x157   :  { %v434_v1 = vpop.f32.mrf.mxu3 }
 0x158   :  { %v458_v3 = vmax.f32 %v434_v1, 0.0 }
 0x15a   :  { %v663_v4 = vpack.c.bf16 %v458_v3, %v457_v2 }
 0x15b   :  { %v419_v5 = vpop.f32.mrf.mxu1 }
 0x15c   :  { %679 = vst [vmem:[#allocation9 + $0x28] sm:$0xff] %v663_v4   ;;  %v452_v7 = vmax.f32 %v419_v5, 0.0 }
 0x15e   :  { %v648_v8 = vpack.c.bf16 %v452_v7, %v451_v6 }
 0x15f   :  { %v437_v9 = vpop.f32.mrf.mxu3 }
 0x160   :  { %676 = vst [vmem:[#allocation9 + $0x10] sm:$0xff] %v648_v8   ;;  %v459_v12 = vmax.f32 %v437_v9, 0.0 }
 0x163   :  { %v422_v10 = vpop.f32.mrf.mxu1 }
 0x164   :  { %v453_v16 = vmax.f32 %v422_v10, 0.0 }
 0x167   :  { %v439_v11 = vpop.f32.mrf.mxu3 }
 0x168   :  { %v460_v13 = vmax.f32 %v439_v11, 0.0 }
 0x16a   :  { %v668_v14 = vpack.c.bf16 %v460_v13, %v459_v12 }
 0x16b   :  { %v424_v15 = vpop.f32.mrf.mxu1 }
 0x16c   :  { %680 = vst [vmem:[#allocation9 + $0x30] sm:$0xff] %v668_v14   ;;  %v454_v17 = vmax.f32 %v424_v15, 0.0 }
 0x16e   :  { %v653_v18 = vpack.c.bf16 %v454_v17, %v453_v16 }
 0x16f   :  { %v442_v19 = vpop.f32.mrf.mxu3 }
 0x170   :  { %677 = vst [vmem:[#allocation9 + $0x18] sm:$0xff] %v653_v18   ;;  %v461_v21 = vmax.f32 %v442_v19, 0.0 }
 0x177   :  { %v444_v20 = vpop.f32.mrf.mxu3 }
 0x178   :  { %v462_v22 = vmax.f32 %v444_v20, 0.0 }
 0x17a   :  { %v673_v23 = vpack.c.bf16 %v462_v22, %v461_v21 }
 0x17c   :  { %681 = vst [vmem:[#allocation9 + $0x38] sm:$0xff] %v673_v23  }
 0x17d   :  { %507 = dma.vmem_to_hbm [thread:$0]  %s500_s27, 1024, %s502_s30, [#allocation5], %s807_s20, %s807_s20, %s808_s21  }
 0x17e   :  { %804 = dma.done.wait [#allocation5], 1024  }
 0x17f   :  { %805 = vsyncadd [#allocation5], 4294966272 }
 0x180   :  { %512 = vsyncpa [#allocation4], 1 }
 0x181   :  { %513 = vsyncpa [#allocation7], 1 }
 0x182   :  { %514 = vsyncpa [#allocation5], 1 }

// kernel: tpu_custom_call.1
= control target key start
LH: loop header
LB: loop body
LE: loop exit
PB: predicated region body
PF: predicated region fallthrough
CT: control target
= control target key end

     0   :  { %8 = vsyncpa [#allocation4], 0  ;;  %s856_s0 = inlined_call_operand.hbm [shape: bf16[128,128], index: 0, kind: input, shape index: {}]   ;;  %s857_s1 = inlined_call_operand.hbm [shape: bf16[128,128], index: 1, kind: input, shape index: {}]   ;;  %s858_s2 = inlined_call_operand.hbm [shape: bf16[128,128], index: 2, kind: input, shape index: {}]   ;;  %s859_s3 = inlined_call_operand.hbm [shape: bf16[128,128], index: 3, kind: output, shape index: {}]  }
   0x1   :  { %9 = vsyncpa [#allocation7], 0 }
   0x2   :  { %10 = vsyncpa [#allocation5], 0  ;;  %s28_s14 = sshll.u32 %s857_s1, 4  ;;  %s806_s15 = smov [#allocation6]   ;;  %s29_s14 = int_to_ptr.hbm [resolvable:$true] %s28_s14 }
   0x3   :  { %s30_s16 = sshll.u32 %s806_s15, 4  ;;  %s15_s19 = sshll.u32 %s856_s0, 4  ;;  %s31_s16 = int_to_ptr.vmem [resolvable:$true] %s30_s16  ;;  %s16_s19 = int_to_ptr.hbm [resolvable:$true] %s15_s19 }
   0x4   :  { %s807_s20 = smov 64   ;;  %s808_s21 = smov 4  }
   0x5   :  { %36 = dma.hbm_to_vmem [thread:$0]  %s29_s14, 1024, %s31_s16, [#allocation7], %s807_s20, %s807_s20, %s808_s21  }
   0x6   :  { %s809_s22 = smov [#allocation3]   ;;  %s41_s1 = sshll.u32 %s858_s2, 4  ;;  %s42_s1 = int_to_ptr.hbm [resolvable:$true] %s41_s1 }
   0x7   :  { %s17_s23 = sshll.u32 %s809_s22, 4  ;;  %s810_s0 = smov [#allocation8]   ;;  %s18_s23 = int_to_ptr.vmem [resolvable:$true] %s17_s23 }
   0x8   :  { %23 = dma.hbm_to_vmem [thread:$0]  %s16_s19, 1024, %s18_s23, [#allocation4], %s807_s20, %s807_s20, %s808_s21  }
   0x9   :  { %s43_s26 = sshll.u32 %s810_s0, 4  ;;  %s44_s26 = int_to_ptr.vmem [resolvable:$true] %s43_s26 }
   0xa   :  { %49 = dma.hbm_to_vmem [thread:$0]  %s42_s1, 1024, %s44_s26, [#allocation7], %s807_s20, %s807_s20, %s808_s21  }
   0xb   :  { %800 = dma.done.wait [#allocation4], 1024  }
   0xc   :  { %801 = vsyncadd [#allocation4], 4294966272 }
   0xd   :  { %802 = dma.done.wait [#allocation7], 2048  }
   0xe   :  { %803 = vsyncadd [#allocation7], 4294965248  ;;  %v626_v0 = vld [vmem:[#allocation6 + $0x38] sm:$0xff]  ;;  %v625_v1 = vld [vmem:[#allocation6 + $0x30] sm:$0xff]  ;;  %s811_s2 = smov [#allocation9]   ;;  %s501_s30 = sshll.u32 %s859_s3, 4  ;;  %s502_s30 = int_to_ptr.hbm [resolvable:$true] %s501_s30 }
   0xf   :  { %226 = vmatpush.bf16.msra.mxu0 %v626_v0  ;;  %682 = vmatpush.bf16.msra.mxu2 %v626_v0  ;;  %v624_v2 = vld [vmem:[#allocation6 + $0x28] sm:$0xff]  ;;  %v623_v3 = vld [vmem:[#allocation6 + $0x20] sm:$0xff]  ;;  %v622_v4 = vld [vmem:[#allocation6 + $0x18] sm:$0xff]  ;;  %s499_s27 = sshll.u32 %s811_s2, 4  ;;  %s500_s27 = int_to_ptr.vmem [resolvable:$true] %s499_s27 }
  0x10   :  { %v621_v5 = vld [vmem:[#allocation6 + $0x10] sm:$0xff]  ;;  %v620_v6 = vld [vmem:[#allocation6 + $0x8] sm:$0xff]  ;;  %v619_v7 = vld [vmem:[#allocation6] sm:$0xff] }
  0x11   :  { %v611_v8 = vld [vmem:[#allocation3] sm:$0xff]  ;;  %v612_v10 = vld [vmem:[#allocation3 + $0x8] sm:$0xff]  ;;  %v634_v12 = vld [vmem:[#allocation8 + $0x38] sm:$0xff] }
  0x12   :  { %v615_v9 = vld [vmem:[#allocation3 + $0x20] sm:$0xff]  ;;  %v616_v11 = vld [vmem:[#allocation3 + $0x28] sm:$0xff]  ;;  %398 = vmatpush.bf16.msra.mxu1 %v634_v12  ;;  %v633_v13 = vld [vmem:[#allocation8 + $0x30] sm:$0xff]  ;;  %690 = vmatpush.bf16.msra.mxu3 %v634_v12 }
  0x13   :  { %227 = vmatpush.bf16.msra.mxu0 %v625_v1  ;;  %683 = vmatpush.bf16.msra.mxu2 %v625_v1  ;;  %v632_v14 = vld [vmem:[#allocation8 + $0x28] sm:$0xff]  ;;  %v631_v15 = vld [vmem:[#allocation8 + $0x20] sm:$0xff]  ;;  %v613_v16 = vld [vmem:[#allocation3 + $0x10] sm:$0xff] }
  0x14   :  { %v617_v17 = vld [vmem:[#allocation3 + $0x30] sm:$0xff]  ;;  %v630_v18 = vld [vmem:[#allocation8 + $0x18] sm:$0xff]  ;;  %v628_v22 = vld [vmem:[#allocation8 + $0x8] sm:$0xff] }
  0x15   :  { %v614_v19 = vld [vmem:[#allocation3 + $0x18] sm:$0xff]  ;;  %v629_v21 = vld [vmem:[#allocation8 + $0x10] sm:$0xff]  ;;  %v627_v23 = vld [vmem:[#allocation8] sm:$0xff] }
  0x16   :  { %399 = vmatpush.bf16.msra.mxu1 %v633_v13  ;;  %691 = vmatpush.bf16.msra.mxu3 %v633_v13  ;;  %v618_v20 = vld [vmem:[#allocation3 + $0x38] sm:$0xff] }
  0x17   :  { %228 = vmatpush.bf16.msra.mxu0 %v624_v2  ;;  %684 = vmatpush.bf16.msra.mxu2 %v624_v2 }
  0x1a   :  { %400 = vmatpush.bf16.msra.mxu1 %v632_v14  ;;  %692 = vmatpush.bf16.msra.mxu3 %v632_v14 }
  0x1b   :  { %229 = vmatpush.bf16.msra.mxu0 %v623_v3  ;;  %685 = vmatpush.bf16.msra.mxu2 %v623_v3 }
  0x1e   :  { %401 = vmatpush.bf16.msra.mxu1 %v631_v15  ;;  %693 = vmatpush.bf16.msra.mxu3 %v631_v15 }
  0x1f   :  { %230 = vmatpush.bf16.msra.mxu0 %v622_v4  ;;  %686 = vmatpush.bf16.msra.mxu2 %v622_v4 }
  0x22   :  { %402 = vmatpush.bf16.msra.mxu1 %v630_v18  ;;  %694 = vmatpush.bf16.msra.mxu3 %v630_v18 }
  0x23   :  { %231 = vmatpush.bf16.msra.mxu0 %v621_v5  ;;  %687 = vmatpush.bf16.msra.mxu2 %v621_v5 }
  0x26   :  { %403 = vmatpush.bf16.msra.mxu1 %v629_v21  ;;  %695 = vmatpush.bf16.msra.mxu3 %v629_v21 }
  0x27   :  { %232 = vmatpush.bf16.msra.mxu0 %v620_v6  ;;  %688 = vmatpush.bf16.msra.mxu2 %v620_v6 }
  0x2a   :  { %404 = vmatpush.bf16.msra.mxu1 %v628_v22  ;;  %696 = vmatpush.bf16.msra.mxu3 %v628_v22 }
  0x2b   :  { %233 = vmatpush.bf16.msra.mxu0 %v619_v7  ;;  %689 = vmatpush.bf16.msra.mxu2 %v619_v7 }
  0x2e   :  { %234 = vmatmul.bf16.vlgmr.msra.gmra.mxu0 %v611_v8  ;;  %254 = vmatmul.bf16.vlgmr.msra.gmra.mxu2 %v615_v9 }
  0x2f   :  { %405 = vmatpush.bf16.msra.mxu1 %v627_v23  ;;  %697 = vmatpush.bf16.msra.mxu3 %v627_v23 }
  0x3e   :  { %239 = vmatmul.bf16.gmra.mxu0 %v612_v10  ;;  %259 = vmatmul.bf16.gmra.mxu2 %v616_v11 }
  0x4e   :  { %244 = vmatmul.bf16.gmra.mxu0 %v613_v16  ;;  %264 = vmatmul.bf16.gmra.mxu2 %v617_v17 }
  0x5e   :  { %249 = vmatmul.bf16.gmra.mxu0 %v614_v19  ;;  %269 = vmatmul.bf16.gmra.mxu2 %v618_v20 }
  0xab   :  { %v235_v24 = vpop.f32.mrf.mxu0 }
  0xb1   :  { %v255_v25 = vpop.f32.mrf.mxu2 }
  0xb3   :  { %v237_v26 = vpop.f32.mrf.mxu0 }
  0xb4   :  { %v326_v27 = vpack.c.bf16 %v237_v26, %v235_v24 }
  0xb6   :  { %406 = vmatmul.bf16.vlgmr.msra.gmra.mxu1 %v326_v27 }
  0xb9   :  { %v257_v28 = vpop.f32.mrf.mxu2 }
  0xba   :  { %v330_v29 = vpack.c.bf16 %v257_v28, %v255_v25 }
  0xbb   :  { %v240_v30 = vpop.f32.mrf.mxu0 }
  0xbc   :  { %426 = vmatmul.bf16.vlgmr.msra.gmra.mxu3 %v330_v29 }
  0xc1   :  { %v260_v31 = vpop.f32.mrf.mxu2 }
  0xc3   :  { %v242_v32 = vpop.f32.mrf.mxu0 }
  0xc4   :  { %v327_v33 = vpack.c.bf16 %v242_v32, %v240_v30 }
  0xc6   :  { %411 = vmatmul.bf16.gmra.mxu1 %v327_v33 }
  0xc9   :  { %v262_v34 = vpop.f32.mrf.mxu2 }
  0xca   :  { %v331_v35 = vpack.c.bf16 %v262_v34, %v260_v31 }
  0xcb   :  { %v245_v36 = vpop.f32.mrf.mxu0 }
  0xcc   :  { %431 = vmatmul.bf16.gmra.mxu3 %v331_v35 }
  0xd1   :  { %v265_v37 = vpop.f32.mrf.mxu2 }
  0xd3   :  { %v247_v38 = vpop.f32.mrf.mxu0 }
  0xd4   :  { %v328_v39 = vpack.c.bf16 %v247_v38, %v245_v36 }
  0xd6   :  { %416 = vmatmul.bf16.gmra.mxu1 %v328_v39 }
  0xd9   :  { %v267_v40 = vpop.f32.mrf.mxu2 }
  0xda   :  { %v332_v41 = vpack.c.bf16 %v267_v40, %v265_v37 }
  0xdb   :  { %v250_v42 = vpop.f32.mrf.mxu0 }
  0xdc   :  { %436 = vmatmul.bf16.gmra.mxu3 %v332_v41 }
  0xe1   :  { %v270_v43 = vpop.f32.mrf.mxu2 }
  0xe3   :  { %v252_v44 = vpop.f32.mrf.mxu0 }
  0xe4   :  { %v329_v45 = vpack.c.bf16 %v252_v44, %v250_v42 }
  0xe6   :  { %421 = vmatmul.bf16.gmra.mxu1 %v329_v45 }
  0xe9   :  { %v272_v46 = vpop.f32.mrf.mxu2 }
  0xea   :  { %v333_v47 = vpack.c.bf16 %v272_v46, %v270_v43 }
  0xec   :  { %441 = vmatmul.bf16.gmra.mxu3 %v333_v47 }
 0x133   :  { %v407_v48 = vpop.f32.mrf.mxu1 }
 0x134   :  { %v447_v50 = vmax.f32 %v407_v48, 0.0 }
 0x13b   :  { %v409_v49 = vpop.f32.mrf.mxu1 }
 0x13c   :  { %v448_v51 = vmax.f32 %v409_v49, 0.0 }
 0x13e   :  { %v638_v52 = vpack.c.bf16 %v448_v51, %v447_v50 }
 0x13f   :  { %v427_v53 = vpop.f32.mrf.mxu3 }
 0x140   :  { %639 = vst [vmem:[#allocation9] sm:$0xff] %v638_v52   ;;  %v455_v56 = vmax.f32 %v427_v53, 0.0 }
 0x143   :  { %v412_v54 = vpop.f32.mrf.mxu1 }
 0x144   :  { %v449_v60 = vmax.f32 %v412_v54, 0.0 }
 0x147   :  { %v429_v55 = vpop.f32.mrf.mxu3 }
 0x148   :  { %v456_v57 = vmax.f32 %v429_v55, 0.0 }
 0x14a   :  { %v658_v58 = vpack.c.bf16 %v456_v57, %v455_v56 }
 0x14b   :  { %v414_v59 = vpop.f32.mrf.mxu1 }
 0x14c   :  { %678 = vst [vmem:[#allocation9 + $0x20] sm:$0xff] %v658_v58   ;;  %v450_v61 = vmax.f32 %v414_v59, 0.0 }
 0x14e   :  { %v643_v62 = vpack.c.bf16 %v450_v61, %v449_v60 }
 0x14f   :  { %v432_v63 = vpop.f32.mrf.mxu3 }
 0x150   :  { %675 = vst [vmem:[#allocation9 + $0x8] sm:$0xff] %v643_v62   ;;  %v457_v2 = vmax.f32 %v432_v63, 0.0 }
 0x153   :  { %v417_v0 = vpop.f32.mrf.mxu1 }
 0x154   :  { %v451_v6 = vmax.f32 %v417_v0, 0.0 }
 0x157   :  { %v434_v1 = vpop.f32.mrf.mxu3 }
 0x158   :  { %v458_v3 = vmax.f32 %v434_v1, 0.0 }
 0x15a   :  { %v663_v4 = vpack.c.bf16 %v458_v3, %v457_v2 }
 0x15b   :  { %v419_v5 = vpop.f32.mrf.mxu1 }
 0x15c   :  { %679 = vst [vmem:[#allocation9 + $0x28] sm:$0xff] %v663_v4   ;;  %v452_v7 = vmax.f32 %v419_v5, 0.0 }
 0x15e   :  { %v648_v8 = vpack.c.bf16 %v452_v7, %v451_v6 }
 0x15f   :  { %v437_v9 = vpop.f32.mrf.mxu3 }
 0x160   :  { %676 = vst [vmem:[#allocation9 + $0x10] sm:$0xff] %v648_v8   ;;  %v459_v12 = vmax.f32 %v437_v9, 0.0 }
 0x163   :  { %v422_v10 = vpop.f32.mrf.mxu1 }
 0x164   :  { %v453_v16 = vmax.f32 %v422_v10, 0.0 }
 0x167   :  { %v439_v11 = vpop.f32.mrf.mxu3 }
 0x168   :  { %v460_v13 = vmax.f32 %v439_v11, 0.0 }
 0x16a   :  { %v668_v14 = vpack.c.bf16 %v460_v13, %v459_v12 }
 0x16b   :  { %v424_v15 = vpop.f32.mrf.mxu1 }
 0x16c   :  { %680 = vst [vmem:[#allocation9 + $0x30] sm:$0xff] %v668_v14   ;;  %v454_v17 = vmax.f32 %v424_v15, 0.0 }
 0x16e   :  { %v653_v18 = vpack.c.bf16 %v454_v17, %v453_v16 }
 0x16f   :  { %v442_v19 = vpop.f32.mrf.mxu3 }
 0x170   :  { %677 = vst [vmem:[#allocation9 + $0x18] sm:$0xff] %v653_v18   ;;  %v461_v21 = vmax.f32 %v442_v19, 0.0 }
 0x177   :  { %v444_v20 = vpop.f32.mrf.mxu3 }
 0x178   :  { %v462_v22 = vmax.f32 %v444_v20, 0.0 }
 0x17a   :  { %v673_v23 = vpack.c.bf16 %v462_v22, %v461_v21 }
 0x17c   :  { %681 = vst [vmem:[#allocation9 + $0x38] sm:$0xff] %v673_v23  }
 0x17d   :  { %507 = dma.vmem_to_hbm [thread:$0]  %s500_s27, 1024, %s502_s30, [#allocation5], %s807_s20, %s807_s20, %s808_s21  }
 0x17e   :  { %804 = dma.done.wait [#allocation5], 1024  }
 0x17f   :  { %805 = vsyncadd [#allocation5], 4294966272 }
 0x180   :  { %512 = vsyncpa [#allocation4], 1 }
 0x181   :  { %513 = vsyncpa [#allocation7], 1 }
 0x182   :  { %514 = vsyncpa [#allocation5], 1 }

</bundles_post_ra>
